<compile_context>
chip_gen: v5e
topology: v5e:2x2
jax: 0.10.0
libtpu: 0.0.40
codegen_flags: <defaults>
</compile_context>

<pallas_src>
import jax
import jax.numpy as jnp
from jax.experimental import pallas as pl
from jax.experimental.pallas import tpu as pltpu


def classifier_kernel(x_ref, w_ref, b_ref, o_ref):
    # x_ref: (TM, H) row tile of flattened input (native dtype)
    # w_ref: (1, H)  lane-dense linear weight (shared across tiles)
    # b_ref: (1,)    bias scalar in SMEM
    # o_ref: (TM, 1) per-row sentence scores (f32)
    x = x_ref[...]                               # keep input dtype (no full-tile cast)
    w = w_ref[...].astype(x.dtype)               # tiny (1, H) cast; broadcasts over rows
    # VPU mul in input precision + cross-lane reduce with f32 accumulation.
    h = jnp.sum(x * w, axis=-1, keepdims=True, dtype=jnp.float32)   # (TM, 1)
    h = h + b_ref[0]                             # scalar bias from SMEM
    o_ref[...] = jax.nn.sigmoid(h).astype(o_ref.dtype)


def _choose_tm(n_rows, h, itemsize):
    """Row-tile size.

    Target ~2 MiB of x per tile (measured >=85% of HBM roofline for streaming
    kernels), bounded so the double-buffered x + lane-padded output buffers
    stay within ~20 MiB (safe on v7x's 64 MiB physical / 32 MiB scoped VMEM).
    Always returns >= 2 grid blocks when n_rows >= 16 so both v7x TensorCores
    participate on the 'parallel' axis.
    """
    h_pad = ((max(h, 1) + 127) // 128) * 128        # lanes pad to 128
    x_row_bytes = h_pad * itemsize                  # one x row in VMEM
    out_row_bytes = 128 * 4                         # (TM, 1) f32 out pads to 128 lanes
    target_tm = (2 * 1024 * 1024) // x_row_bytes    # ~2 MiB of x per tile
    vmem_cap_tm = (20 * 1024 * 1024) // (2 * (x_row_bytes + out_row_bytes))
    tm = min(target_tm, vmem_cap_tm, 16384)
    tm = max(8, (tm // 8) * 8)

    if n_rows <= tm:
        if n_rows >= 16:
            # Split into at least two blocks (multiple of 8 rows) for v7x's 2 TCs.
            tm = max(8, ((n_rows + 15) // 16) * 8)
        else:
            tm = n_rows      # full-dim block -> always layout-legal
    return tm


def classifier_forward(x, w, b, mask_cls):
    """x: [B, S, H] (f32 or bf16), w: [1, H] (nn.Linear weight), b: [1],
    mask_cls: [B, S] (any dtype). Returns sent_scores [B, S] f32."""
    B, S, H = x.shape
    N = B * S

    x2 = x.reshape(N, H)                    # contiguous reshape: free in XLA
    w_row = w.reshape(1, H)                 # keep dtype; cast in-kernel
    b1 = b.reshape(1).astype(jnp.float32)   # single scalar -> SMEM

    TM = _choose_tm(N, H, x.dtype.itemsize)
    grid = (pl.cdiv(N, TM),)

    scores = pl.pallas_call(
        classifier_kernel,
        out_shape=jax.ShapeDtypeStruct((N, 1), jnp.float32),
        grid_spec=pltpu.PrefetchScalarGridSpec(
            num_scalar_prefetch=0,
            grid=grid,
            in_specs=[
                pl.BlockSpec((TM, H), lambda i: (i, 0)),            # x row tile
                pl.BlockSpec((1, H), lambda i: (0, 0)),             # weight (shared)
                pl.BlockSpec(memory_space=pltpu.MemorySpace.SMEM),  # bias scalar
            ],
            out_specs=pl.BlockSpec((TM, 1), lambda i: (i, 0)),
        ),
        compiler_params=pltpu.CompilerParams(
            dimension_semantics=("parallel",),
            vmem_limit_bytes=32 * 1024 * 1024,   # raises v5e's 16 MiB default
        ),
    )(x2, w_row, b1)

    # Mask applied as a cheap O(B*S) XLA elementwise op in the wrapper
    # (keeps the lane-sparse (TM, 1) mask DMA stream out of the kernel).
    return scores.reshape(B, S) * mask_cls.astype(jnp.float32)


if __name__ == "__main__":
    B, S, H = 2, 8, 32   # batch, num sentences (seq), hidden_size

    key = jax.random.PRNGKey(0)
    kx, kw, kb, km = jax.random.split(key, 4)

    x = jax.random.normal(kx, (B, S, H), dtype=jnp.float32)
    # Synthetic nn.Linear(hidden_size, 1) parameters:
    w = jax.random.normal(kw, (1, H), dtype=jnp.float32) * 0.1   # weight [1, H]
    b = jax.random.normal(kb, (1,), dtype=jnp.float32) * 0.1     # bias   [1]
    mask_cls = (jax.random.uniform(km, (B, S)) > 0.3).astype(jnp.float32)

    out = classifier_forward(x, w, b, mask_cls)
    out = jax.block_until_ready(out)

    # Pure-JAX reference (same math as the PyTorch forward)
    ref = jax.nn.sigmoid(jnp.einsum("bsh,h->bs", x, w[0]) + b[0]) * mask_cls
    assert out.shape == (B, S)
    assert jnp.allclose(out, ref, atol=1e-5, rtol=1e-5)

    print("KERNEL_OK")
</pallas_src>

<mosaic_0001>
module attributes {stable_mosaic.version = 11 : i64} {
  func.func @classifier_kernel(%arg0: i32, %arg1: memref<8x32xf32, #tpu.memory_space<vmem>>, %arg2: memref<1x32xf32, #tpu.memory_space<vmem>>, %arg3: memref<1xf32, #tpu.memory_space<smem>>, %arg4: memref<8x1xf32, #tpu.memory_space<vmem>>) attributes {dimension_semantics = [#tpu.dimension_semantics<parallel>], iteration_bounds = array<i64: 2>, scalar_prefetch = 0 : i64, scratch_operands = 0 : i64, tpu.core_type = #tpu.core_type<tc>, window_params = [{transform_indices = @transform_0, window_bounds = array<i64: 8, 32>}, {pipeline_mode = #tpu.pipeline_mode<synchronous>, transform_indices = @transform_1, window_bounds = array<i64: 1, 32>}, {transform_indices = @transform_2, window_bounds = array<i64: 1>}, {transform_indices = @transform_3, window_bounds = array<i64: 8, 1>}]} {
    %c0 = arith.constant 0 : index
    %c0_0 = arith.constant 0 : index
    %0 = vector.load %arg1[%c0, %c0_0] : memref<8x32xf32, #tpu.memory_space<vmem>>, vector<8x32xf32>
    %c0_1 = arith.constant 0 : index
    %c0_2 = arith.constant 0 : index
    %1 = vector.load %arg2[%c0_1, %c0_2] : memref<1x32xf32, #tpu.memory_space<vmem>>, vector<1x32xf32>
    %2 = vector.broadcast %1 : vector<1x32xf32> to vector<8x32xf32>
    %3 = arith.mulf %0, %2 : vector<8x32xf32>
    %cst = arith.constant dense<0.000000e+00> : vector<8xf32>
    %4 = vector.multi_reduction <add>, %3, %cst [1] : vector<8x32xf32> to vector<8xf32>
    %5 = vector.shape_cast %4 : vector<8xf32> to vector<8x1xf32>
    %c0_3 = arith.constant 0 : index
    %6 = memref.load %arg3[%c0_3] : memref<1xf32, #tpu.memory_space<smem>>
    %7 = vector.broadcast %6 : f32 to vector<8x1xf32>
    %8 = arith.addf %5, %7 : vector<8x1xf32>
    %9 = arith.negf %8 : vector<8x1xf32>
    %10 = math.exp %9 : vector<8x1xf32>
    %cst_4 = arith.constant 1.000000e+00 : f32
    %11 = vector.broadcast %cst_4 : f32 to vector<8x1xf32>
    %12 = arith.addf %11, %10 : vector<8x1xf32>
    %13 = arith.divf %11, %12 : vector<8x1xf32>
    %c0_5 = arith.constant 0 : index
    %c0_6 = arith.constant 0 : index
    %14 = vector.load %arg4[%c0_5, %c0_6] : memref<8x1xf32, #tpu.memory_space<vmem>>, vector<8x1xf32>
    tpu.vector_store %arg4[%c0_5, %c0_6], %13 {strides = array<i32>} : memref<8x1xf32, #tpu.memory_space<vmem>>, vector<8x1xf32>,
    return
  }
  func.func @transform_0(%arg0: i32) -> (i32, i32) {
    %c0_i32 = arith.constant 0 : i32
    %c0_i32_0 = arith.constant 0 : i32
    return %arg0, %c0_i32 : i32, i32
  }
  func.func @transform_1(%arg0: i32) -> (i32, i32) {
    %c0_i32 = arith.constant 0 : i32
    %c0_i32_0 = arith.constant 0 : i32
    %c0_i32_1 = arith.constant 0 : i32
    return %c0_i32, %c0_i32_0 : i32, i32
  }
  func.func @transform_2(%arg0: i32) -> i32 {
    %c0_i32 = arith.constant 0 : i32
    %c0_i32_0 = arith.constant 0 : i32
    return %c0_i32 : i32
  }
  func.func @transform_3(%arg0: i32) -> (i32, i32) {
    %c0_i32 = arith.constant 0 : i32
    %c0_i32_0 = arith.constant 0 : i32
    return %arg0, %c0_i32 : i32, i32
  }
}

</mosaic_0001>

<bundles_post_ra>
// kernel: tpu_custom_call.1
= control target key start
LH: loop header
LB: loop body
LE: loop exit
PB: predicated region body
PF: predicated region fallthrough
CT: control target
= control target key end

     0   :  { %s529_s0 = inlined_call_operand.hbm [shape: f32[16,32], index: 0, kind: input, shape index: {}]   ;;  %s530_s1 = inlined_call_operand.vmem [shape: f32[1,32], index: 1, kind: input, shape index: {}]   ;;  %s531_s2 = inlined_call_operand.<no memory space> [shape: f32[1], index: 2, kind: input, shape index: {}]   ;;  %s532_s3 = inlined_call_operand.vmem [shape: f32[16,1], index: 3, kind: output, shape index: {}]  }
   0x1   :  { %8 = sst [smem:[#allocation2]] %s531_s2 }
   0x2   :  { %9 = vsyncpa [#allocation4], 0 }
   0x3   :  { %11 = vsyncpa [#allocation4 + $0x1], 0  ;;  %s432_s14 = smov 0   ;;  %s434_s15 = smov 0  }
   0x4   :  { %s436_s16 = smov 0   ;;  %s438_s17 = smov 0  }
   0x5 LB: > { %s451_s2 = sadd.s32 4294967295, %s407_s17   ;;  %s454_s18 = sadd.s32 1, %s407_s17   ;;  %s407_s17 = sphi %s438_s17, %s539_s17   ;;  %s403_s16 = sphi %s436_s16, %s538_s16   ;;  %s399_s15 = sphi %s434_s15, %s537_s15   ;;  %s395_s14 = sphi %s432_s14, %s536_s14  }
   0x6   : > { %s21_s19 = ssub.s32 %s407_s17, %s454_s18  ;;  %s24_s20 = sadd.s32 1, %s403_s16 }
   0x7   : > { %p22_p0 = scmp.eq.s32.totalorder %s21_s19, 0  ;;  %p31_p1 = scmp.ne.s32.totalorder %s403_s16, %s399_s15 }
   0x8   : > { %p32_p2 = scmp.eq.s32.totalorder %s407_s17, 0  ;;  %p37_p3 = scmp.ne.s32.totalorder %s399_s15, %s395_s14 }
   0x9   : > { %s464_s21 = scalar_select %p22_p0, %s403_s16, %s24_s20  }
   0xa   : > { %p466_p4 = por %p32_p2, %p31_p1  ;;  %p38_p5 = scmp.eq.s32.totalorder %s451_s2, 0 }
   0xb   : > { %p305_p6 = scmp.lt.s32.totalorder %s407_s17, 2  ;;  %s135_s24 = sand.u32 1, %s403_s16  }
   0xc   : > { %p472_p7 = por %p38_p5, %p37_p3  ;;  %s291_s25 = sshll.u32 %s135_s24, 3 }
   0xd   : > { %s292_s26 = sshll.u32 %s407_s17, 3  ;;  %s139_s30 = scalar_lea.vmem [#allocation3], %s291_s25 }
   0xe   : > { %s143_s29 = scalar_lea.hbm %s529_s0, %s292_s26  ;;  %s147_s4 = sshll.u32 %s139_s30, 4  ;;  %s148_s4 = int_to_ptr.vmem [resolvable:$true] %s147_s4 }
   0xf   : > { %s145_s5 = sshll.u32 %s143_s29, 4  ;;  %p483_p8 = pnand %p305_p6, %p466_p4  ;;  %s146_s5 = int_to_ptr.hbm [resolvable:$true] %s145_s5 }
  0x10   : > { %p293_p9 = scmp.ge.s32.totalorder %s407_s17, 1  ;;  %p152_p10 = scmp.lt.s32.totalorder %s407_s17, 3 }
  0x11   : > { %s136_s7 = scalar_lea.sflag [#allocation4], %s135_s24  ;;  %s343_s8 = sshra.s32 %s146_s5, 4  ;;  %s344_s8 = int_to_ptr.hbm [resolvable:$true] %s343_s8 }
  0x12   : > { %s345_s9 = scalar_lea.hbm %s344_s8, 8  ;;  %p347_p12 = pneg %p483_p8 }
  0x13   : > { %p346_p11 = scmp.ne.s32.totalorder %s344_s8, %s345_s9  ;;  %s350_s12 = scalar_lea.hbm %s529_s0, 16 }
  0x14   : > { %p351_p1 = scmp.lt.s32.totalorder %s344_s8, %s529_s0  ;;  %p352_p2 = scmp.lt.s32.totalorder %s350_s12, %s345_s9 }
  0x15   : > { %p348_p13 = pnand %p347_p12, %p346_p11 }
  0x16   : > { %p353_p3 = por %p352_p2, %p351_p1 }
  0x17   : > { %p349_p0 = pneg %p348_p13 }
  0x19   : > { %p354_p4 = pnand %p353_p3, %p349_p0 }
  0x1b   : > { %357 = shalt.err (!%p354_p4)
}
  0x1c   : > { %304 = dma.hbm_to_vmem [thread:$0]  (!%p483_p8), %s146_s5, 128, %s148_s4, %s136_s7  }
  0x1d   : > { %p153_p5 = pnand %p293_p9, %p152_p10 }
  0x1e   : > { %s158_s19 = sand.u32 (!%p153_p5), 1, %s399_s15  }
  0x1f   : > { %156 = sbr.rel (%p153_p5) target bundleno = 189 (0xbd), region = 32  ;;  %s294_s20 = sshll.u32 (!%p153_p5), %s158_s19, 3 }
  0x20   : > { %s159_s22 = scalar_lea.sflag (!%p153_p5), [#allocation4], %s158_s19  ;;  %s162_s24 = scalar_lea.vmem (!%p153_p5), [#allocation3], %s294_s20 }
  0x24   : > { %390 = dma.done.wait (%p472_p7), %s159_s22, 128  }
  0x25   : > { %392 = vsyncadd (%p472_p7), %s159_s22, 4294967168  ;;  %v189_v0 = vld [vmem:[%s162_s24] sm:$0xff]  ;;  %vm195_vm0 = vcmask 261120   ;;  %s199_s17 = sld [smem:[#allocation2]]  ;;  %p185_p6 = scmp.lt.s32.totalorder %s451_s2, 1  ;;  %vm221_vm4 = vcmask 7168  }
  0x26   : > { %v338_v1 = vld [vmem:[%s530_s1] ss:$0 sm:$0xff] }
  0x27   : > { %v194_v2 = vmul.f32 %v338_v1, %v189_v0  ;;  %s541_s2 = smov (!%p185_p6, %s451_s2), 1 }
  0x28   : > { %s295_s23 = sshll.u32 %s541_s2, 3 }
  0x29   : > { %v196_v3 = vsel %vm195_vm0, %v194_v2, 0.0  ;;  %s188_s29 = scalar_lea.vmem %s532_s3, %s295_s23 }
  0x2a   : > { %197 = vadd.xlane.f32.xlu0 %v196_v3 }
  0x2b   : > { %v200_v4 = vstv %s199_s17 }
  0x9d   : > { %v198_v5 = vpop.xlane.xlu0 %197 }
  0x9e   : > { %v201_v6 = vadd.f32 %v200_v4, %v198_v5 }
  0xa0   : > { %v296_v7 = vmul.f32 -1.442695, %v201_v6 }
  0xa2   : > { %339 = vpow2.f32 %v296_v7 }
  0xa8   : > { %v340_v8 = vpop.eup %339 }
  0xa9   : > { %v205_v9 = vadd.f32 1.0, %v340_v8 }
  0xab   : > { %341 = vrcp.f32 %v205_v9  ;;  %v217_v13 = vand.u32 2147483648, %v205_v9  ;;  %v215_v15 = vand.u32 2147483647, %v205_v9  ;;  %vm211_vm2 = vweird.f32 %v205_v9 }
  0xad   : > { %v218_v17 = vor.u32 1.1754944e-38, %v217_v13  ;;  %vm216_vm5 = vcmp.eq.f32.partialorder %v215_v15, 8.507059e+37 }
  0xb1   : > { %v342_v10 = vpop.eup %341 }
  0xb2   : > { %v207_v11 = vmul.f32 %v342_v10, %v205_v9  ;;  %vm212_vm1 = vweird.f32 %v342_v10 }
  0xb3   : > { %vm213_vm3 = vmor %vm211_vm2, %vm212_vm1 }
  0xb4   : > { %v208_v12 = vsub.f32 1.0, %v207_v11 }
  0xb6   : > { %v209_v14 = vmul.f32 %v342_v10, %v208_v12 }
  0xb8   : > { %v210_v16 = vadd.f32 %v342_v10, %v209_v14 }
  0xba   : > { %v214_v18 = vsel %vm213_vm3, %v342_v10, %v210_v16 }
  0xbb   : > { %v219_v19 = vsel %vm216_vm5, %v218_v17, %v214_v18 }
  0xbc   : > { %222 = vst.msk [vmem:[%s188_s29] sm:$0xff] %vm221_vm4, %v219_v19 }
  0xbd PF: > { %p14_p7 = scmp.ge.s32.totalorder %s454_s18, 4   ;;  %s536_s14 = smov %s399_s15 }
  0xbe   : > { %s537_s15 = smov %s403_s16  ;;  %s538_s16 = smov %s464_s21 }
  0xbf   : > { %s539_s17 = smov %s454_s18  ;;  %16 = sbr.rel (!%p14_p7) target bundleno = 5 (0x5), region = 72 }
  0xc4   :  { %242 = vsyncpa [#allocation4], 1 }
  0xc5   :  { %244 = vsyncpa [#allocation4 + $0x1], 1 }

</bundles_post_ra>
